<compile_context>
chip_gen: v5e
topology: v5e:2x2
jax: 0.10.0
libtpu: 0.0.40
codegen_flags: <defaults>
</compile_context>

<pallas_src>
import functools

import jax
import jax.numpy as jnp
from jax import lax
from jax.experimental import pallas as pl
from jax.experimental.pallas import tpu as pltpu


def _adaptive_attn_kernel(gq_ref, gkv_ref, q_in_ref, kv_in_ref, ow_ref, o_ref,
                          q_sc, m_sc, l_sc, acc_sc, *,
                          num_w, scale, use_softclamp, softclamp_value):
    """One grid step = one (batch, head, kv-tile).

    Block shapes seen by the kernel (after BlockSpec squeezing):
      gq_ref   : (N,  W)        gates for the full query range       (fp32)
      gkv_ref  : (TKV, W)       gates for this kv tile               (fp32)
      q_in_ref : (W, N, D)      per-w query projections              (bf16)
      kv_in_ref: (W, 2, TKV, D) per-w key / value projections        (bf16)
      ow_ref   : (W, D, dim)    per-w output projection weights      (bf16)
      o_ref    : (N, dim)       output block (written at last kv)
    VMEM scratch (persists across the kv axis):
      q_sc  : (N, D) bf16   gated + scaled q
      m_sc  : (N, 1) f32    running row max
      l_sc  : (N, 1) f32    running row sum
      acc_sc: (N, D) f32    un-normalized output accumulator
    """
    W = num_w
    kv = pl.program_id(2)

    # --- init (first kv tile of this (b, h)): reset online-softmax state and
    #     fold the adaptive-weight gating into q exactly once. ---------------
    @pl.when(kv == 0)
    def _():
        m_sc[...] = jnp.full_like(m_sc, -jnp.inf)
        l_sc[...] = jnp.zeros_like(l_sc)
        acc_sc[...] = jnp.zeros_like(acc_sc)
        g = gq_ref[...]                                           # (N, W) fp32
        qg = q_in_ref[0].astype(jnp.float32) * g[:, 0:1]
        for wi in range(1, W):
            qg = qg + q_in_ref[wi].astype(jnp.float32) * g[:, wi:wi + 1]
        q_sc[...] = (qg * scale).astype(q_sc.dtype)               # bf16

    # --- gated reduction over adaptive weights for this kv tile -------------
    g_kv = gkv_ref[...]                                           # (TKV, W) fp32
    k_t = kv_in_ref[0, 0].astype(jnp.float32) * g_kv[:, 0:1]
    v_t = kv_in_ref[0, 1].astype(jnp.float32) * g_kv[:, 0:1]
    for wi in range(1, W):
        k_t = k_t + kv_in_ref[wi, 0].astype(jnp.float32) * g_kv[:, wi:wi + 1]
        v_t = v_t + kv_in_ref[wi, 1].astype(jnp.float32) * g_kv[:, wi:wi + 1]

    # --- attention scores for this tile: (N, TKV), bf16 MXU, fp32 accum -----
    s = lax.dot_general(
        q_sc[...], k_t.astype(jnp.bfloat16),
        dimension_numbers=(((1,), (1,)), ((), ())),
        preferred_element_type=jnp.float32)
    if use_softclamp:
        # Kept in fp32 for portability (v5e EUP has no bf16); on v6e/v7x the
        # tanh/exp could run in bf16 for ~2x EUP throughput.
        s = jnp.tanh(s * (1.0 / softclamp_value)) * softclamp_value

    # --- online softmax update -----------------------------------------------
    m_prev = m_sc[...]
    m_new = jnp.maximum(m_prev, jnp.max(s, axis=-1, keepdims=True))
    alpha = jnp.exp(m_prev - m_new)
    p = jnp.exp(s - m_new)
    l_sc[...] = alpha * l_sc[...] + jnp.sum(p, axis=-1, keepdims=True)
    acc_sc[...] = alpha * acc_sc[...] + jnp.dot(
        p.astype(jnp.bfloat16), v_t.astype(jnp.bfloat16),
        preferred_element_type=jnp.float32)
    m_sc[...] = m_new

    # --- finalize: normalize, per-w output projection, gated sum over w -----
    @pl.when(kv == pl.num_programs(2) - 1)
    def _():
        g = gq_ref[...]                                           # (N, W) fp32
        out_nd = acc_sc[...] * pl.reciprocal(l_sc[...], approx=True)
        out_bf = out_nd.astype(jnp.bfloat16)
        res = jnp.dot(out_bf, ow_ref[0],
                      preferred_element_type=jnp.float32) * g[:, 0:1]
        for wi in range(1, W):
            res = res + jnp.dot(out_bf, ow_ref[wi],
                                preferred_element_type=jnp.float32) * g[:, wi:wi + 1]
        o_ref[...] = res.astype(o_ref.dtype)


def adaptive_attention_pallas(x, params, *, heads, dim_head, num_adaptive_weights,
                              use_softclamp=False, softclamp_value=50.0,
                              kv_tile=None):
    B, N, dim = x.shape
    H, D, W = heads, dim_head, num_adaptive_weights
    assert W > 1, "this implementation covers the gated (num_adaptive_weights > 1) path"
    scale = D ** -0.5

    if kv_tile is None:
        kv_tile = min(N, 512)
    assert N % kv_tile == 0 and (kv_tile % 8 == 0 or kv_tile == N)
    nkv = N // kv_tile

    # --- glue: linear projections + layout (plain JAX / XLA) -----------------
    # to_qkv packing is (qkv, h, d, w); expose qkv / w as leading axes so the
    # kernel never lane-slices below 128-lane boundaries.  bf16 for the DMA
    # stream and MXU operands.
    qkv = (x @ params["w_qkv"]).reshape(B, N, 3, H, D, W)
    qkv = qkv.transpose(0, 3, 5, 2, 1, 4).astype(jnp.bfloat16)    # (B,H,W,3,N,D)
    q_in = qkv[:, :, :, 0]                                        # (B,H,W,N,D)
    kv_in = qkv[:, :, :, 1:3]                                     # (B,H,W,2,N,D)

    gates = (x @ params["w_gates"]).reshape(B, N, H, W)
    gates = jax.nn.softmax(gates, axis=-1).transpose(0, 2, 1, 3)  # (B,H,N,W) fp32

    # to_out_weights: (H, D, dim*W) with column e = d_out*W + w  ->  (H, W, D, dim)
    # so the kernel does one aligned (N,D)@(D,dim) matmul per adaptive weight.
    ow = params["to_out_weights"].reshape(H, D, dim, W)
    ow = ow.transpose(0, 3, 1, 2).astype(jnp.bfloat16)            # (H, W, D, dim)

    kernel = functools.partial(
        _adaptive_attn_kernel, num_w=W, scale=scale,
        use_softclamp=use_softclamp, softclamp_value=softclamp_value)

    out = pl.pallas_call(
        kernel,
        out_shape=jax.ShapeDtypeStruct((B, H, N, dim), x.dtype),
        grid=(B, H, nkv),
        in_specs=[
            # full-N gates (init + finalize); constant along kv -> resident
            pl.BlockSpec((None, None, N, W), lambda b, h, kv: (b, h, 0, 0)),
            # gates for this kv tile
            pl.BlockSpec((None, None, kv_tile, W), lambda b, h, kv: (b, h, kv, 0)),
            # per-w query projections; constant along kv -> resident
            pl.BlockSpec((None, None, W, N, D), lambda b, h, kv: (b, h, 0, 0, 0)),
            # per-w key / value projections for this kv tile
            pl.BlockSpec((None, None, W, 2, kv_tile, D),
                         lambda b, h, kv: (b, h, 0, 0, kv, 0)),
            # per-head output-projection weights (constant along b and kv)
            pl.BlockSpec((None, W, D, dim), lambda b, h, kv: (h, 0, 0, 0)),
        ],
        out_specs=pl.BlockSpec((None, None, N, dim), lambda b, h, kv: (b, h, 0, 0)),
        scratch_shapes=[
            pltpu.VMEM((N, D), jnp.bfloat16),   # gated, scaled q
            pltpu.VMEM((N, 1), jnp.float32),    # running row max
            pltpu.VMEM((N, 1), jnp.float32),    # running row sum
            pltpu.VMEM((N, D), jnp.float32),    # output accumulator
        ],
        compiler_params=pltpu.CompilerParams(
            # B and H shard across TensorCores (v7x megacore); kv is the reduction.
            dimension_semantics=("parallel", "parallel", "arbitrary")),
        # TODO(synk): set vmem_limit_bytes and tune kv_tile (plus an optional
        # query tile) per chip generation for production sequence lengths.
    )(gates, gates, q_in, kv_in, ow)

    return out   # (B, H, N, dim) -- module layout for the gated path


def adaptive_attention_ref(x, params, *, heads, dim_head, num_adaptive_weights,
                           use_softclamp=False, softclamp_value=50.0):
    """Pure-JAX reference mirroring the PyTorch forward (gated path)."""
    B, N, dim = x.shape
    H, D, W = heads, dim_head, num_adaptive_weights
    scale = D ** -0.5

    qkv = (x @ params["w_qkv"]).reshape(B, N, 3, H, D, W).transpose(2, 0, 3, 1, 4, 5)
    gates = jax.nn.softmax(
        (x @ params["w_gates"]).reshape(B, N, H, W).transpose(0, 2, 1, 3), axis=-1)

    qkv = (qkv * gates[None, :, :, :, None, :]).sum(-1)         # (3, B, H, N, D)
    q, k, v = qkv
    q = q * scale
    sim = jnp.einsum("bhid,bhjd->bhij", q, k)
    if use_softclamp:
        sim = jnp.tanh(sim / softclamp_value) * softclamp_value
    attn = jax.nn.softmax(sim, axis=-1)
    out = jnp.einsum("bhij,bhjd->bhid", attn, v)
    out = jnp.einsum("bhnd,hde->bhne", out, params["to_out_weights"])
    out = out.reshape(B, H, N, dim, W)
    out = (out * gates[:, :, :, None, :]).sum(-1)               # (B, H, N, dim)
    return out


if __name__ == "__main__":
    # Small config consistent with the module.
    B, N = 2, 16
    dim, dim_head, heads = 32, 16, 4
    num_adaptive_weights = 2          # > 1 -> gating active
    use_softclamp, softclamp_value = True, 50.0
    dim_inner = dim_head * heads

    key = jax.random.PRNGKey(0)
    k1, k2, k3, k4 = jax.random.split(key, 4)

    params = {
        # Linear(dim, dim_inner * W * 3, bias=False), stored as (in, out)
        "w_qkv": jax.random.normal(k1, (dim, 3 * dim_inner * num_adaptive_weights),
                                   jnp.float32) * 0.05,
        # Linear(dim, W * heads, bias=False), stored as (in, out)
        "w_gates": jax.random.normal(k2, (dim, heads * num_adaptive_weights),
                                     jnp.float32) * 0.05,
        # nn.Parameter(torch.randn(heads, dim_head, dim * W))
        "to_out_weights": jax.random.normal(
            k3, (heads, dim_head, dim * num_adaptive_weights), jnp.float32),
    }
    x = jax.random.normal(k4, (B, N, dim), jnp.float32)

    out = adaptive_attention_pallas(
        x, params, heads=heads, dim_head=dim_head,
        num_adaptive_weights=num_adaptive_weights,
        use_softclamp=use_softclamp, softclamp_value=softclamp_value,
        kv_tile=8)   # 2 kv tiles -> exercises the online-softmax path
    out = jax.block_until_ready(out)

    ref = adaptive_attention_ref(
        x, params, heads=heads, dim_head=dim_head,
        num_adaptive_weights=num_adaptive_weights,
        use_softclamp=use_softclamp, softclamp_value=softclamp_value)
    ref = jax.block_until_ready(ref)

    assert out.shape == (B, heads, N, dim)
    # bf16 MXU operands (q/k, attn/v, output projection) + approx reciprocal
    # -> slightly looser tolerance than pure fp32.
    assert jnp.allclose(out, ref, atol=2e-2, rtol=2e-2), "mismatch vs pure-JAX reference"

    print("KERNEL_OK")
</pallas_src>

<mosaic_0001>
module attributes {stable_mosaic.version = 11 : i64} {
  func.func @_adaptive_attn_kernel(%arg0: i32, %arg1: i32, %arg2: i32, %arg3: memref<1x1x16x2xf32, #tpu.memory_space<vmem>>, %arg4: memref<1x1x8x2xf32, #tpu.memory_space<vmem>>, %arg5: memref<1x1x2x16x16xbf16, #tpu.memory_space<vmem>>, %arg6: memref<1x1x2x2x8x16xbf16, #tpu.memory_space<vmem>>, %arg7: memref<1x2x16x32xbf16, #tpu.memory_space<vmem>>, %arg8: memref<1x1x16x32xf32, #tpu.memory_space<vmem>>, %arg9: memref<16x16xbf16, #tpu.memory_space<vmem>>, %arg10: memref<16x1xf32, #tpu.memory_space<vmem>>, %arg11: memref<16x1xf32, #tpu.memory_space<vmem>>, %arg12: memref<16x16xf32, #tpu.memory_space<vmem>>) attributes {dimension_semantics = [#tpu.dimension_semantics<parallel>, #tpu.dimension_semantics<parallel>, #tpu.dimension_semantics<arbitrary>], iteration_bounds = array<i64: 2, 4, 2>, scalar_prefetch = 0 : i64, scratch_operands = 4 : i64, tpu.core_type = #tpu.core_type<tc>, window_params = [{transform_indices = @transform_0, window_bounds = array<i64: 1, 1, 16, 2>}, {transform_indices = @transform_1, window_bounds = array<i64: 1, 1, 8, 2>}, {transform_indices = @transform_2, window_bounds = array<i64: 1, 1, 2, 16, 16>}, {transform_indices = @transform_3, window_bounds = array<i64: 1, 1, 2, 2, 8, 16>}, {transform_indices = @transform_4, window_bounds = array<i64: 1, 2, 16, 32>}, {transform_indices = @transform_5, window_bounds = array<i64: 1, 1, 16, 32>}]} {
    %c0_i32 = arith.constant 0 : i32
    %0 = arith.cmpi eq, %arg2, %c0_i32 : i32
    %1 = arith.extui %0 : i1 to i32
    %c0_i32_0 = arith.constant 0 : i32
    %2 = arith.cmpi ne, %1, %c0_i32_0 : i32
    scf.if %2 {
      %cst_47 = arith.constant 0xFF800000 : f32
      %66 = vector.broadcast %cst_47 : f32 to vector<16x1xf32>
      %c0_48 = arith.constant 0 : index
      %c0_49 = arith.constant 0 : index
      %67 = vector.load %arg10[%c0_48, %c0_49] : memref<16x1xf32, #tpu.memory_space<vmem>>, vector<16x1xf32>
      tpu.vector_store %arg10[%c0_48, %c0_49], %66 {strides = array<i32>} : memref<16x1xf32, #tpu.memory_space<vmem>>, vector<16x1xf32>,
      %cst_50 = arith.constant 0.000000e+00 : f32
      %68 = vector.broadcast %cst_50 : f32 to vector<16x1xf32>
      %c0_51 = arith.constant 0 : index
      %c0_52 = arith.constant 0 : index
      %69 = vector.load %arg11[%c0_51, %c0_52] : memref<16x1xf32, #tpu.memory_space<vmem>>, vector<16x1xf32>
      tpu.vector_store %arg11[%c0_51, %c0_52], %68 {strides = array<i32>} : memref<16x1xf32, #tpu.memory_space<vmem>>, vector<16x1xf32>,
      %cst_53 = arith.constant 0.000000e+00 : f32
      %70 = vector.broadcast %cst_53 : f32 to vector<16x16xf32>
      %c0_54 = arith.constant 0 : index
      %c0_55 = arith.constant 0 : index
      %71 = vector.load %arg12[%c0_54, %c0_55] : memref<16x16xf32, #tpu.memory_space<vmem>>, vector<16x16xf32>
      tpu.vector_store %arg12[%c0_54, %c0_55], %70 {strides = array<i32>} : memref<16x16xf32, #tpu.memory_space<vmem>>, vector<16x16xf32>,
      %c0_56 = arith.constant 0 : index
      %c0_57 = arith.constant 0 : index
      %c0_58 = arith.constant 0 : index
      %c0_59 = arith.constant 0 : index
      %72 = vector.load %arg3[%c0_56, %c0_57, %c0_58, %c0_59] : memref<1x1x16x2xf32, #tpu.memory_space<vmem>>, vector<1x1x16x2xf32>
      %73 = vector.shape_cast %72 : vector<1x1x16x2xf32> to vector<16x2xf32>
      %c0_60 = arith.constant 0 : index
      %c0_61 = arith.constant 0 : index
      %c0_62 = arith.constant 0 : index
      %c0_63 = arith.constant 0 : index
      %c0_64 = arith.constant 0 : index
      %74 = vector.load %arg5[%c0_60, %c0_61, %c0_62, %c0_63, %c0_64] : memref<1x1x2x16x16xbf16, #tpu.memory_space<vmem>>, vector<1x1x1x16x16xbf16>
      %75 = vector.shape_cast %74 : vector<1x1x1x16x16xbf16> to vector<16x16xbf16>
      %76 = arith.extf %75 : vector<16x16xbf16> to vector<16x16xf32>
      %77 = vector.extract_strided_slice %73 {offsets = [0, 0], sizes = [16, 1], strides = [1, 1]} : vector<16x2xf32> to vector<16x1xf32>
      %78 = vector.broadcast %77 : vector<16x1xf32> to vector<16x16xf32>
      %79 = arith.mulf %76, %78 : vector<16x16xf32>
      %c0_65 = arith.constant 0 : index
      %c0_66 = arith.constant 0 : index
      %c1_67 = arith.constant 1 : index
      %c0_68 = arith.constant 0 : index
      %c0_69 = arith.constant 0 : index
      %80 = vector.load %arg5[%c0_65, %c0_66, %c1_67, %c0_68, %c0_69] : memref<1x1x2x16x16xbf16, #tpu.memory_space<vmem>>, vector<1x1x1x16x16xbf16>
      %81 = vector.shape_cast %80 : vector<1x1x1x16x16xbf16> to vector<16x16xbf16>
      %82 = arith.extf %81 : vector<16x16xbf16> to vector<16x16xf32>
      %83 = vector.extract_strided_slice %73 {offsets = [0, 1], sizes = [16, 1], strides = [1, 1]} : vector<16x2xf32> to vector<16x1xf32>
      %84 = vector.broadcast %83 : vector<16x1xf32> to vector<16x16xf32>
      %85 = arith.mulf %82, %84 : vector<16x16xf32>
      %86 = arith.addf %79, %85 : vector<16x16xf32>
      %cst_70 = arith.constant 2.500000e-01 : f32
      %87 = vector.broadcast %cst_70 : f32 to vector<16x16xf32>
      %88 = arith.mulf %86, %87 : vector<16x16xf32>
      %89 = arith.truncf %88 : vector<16x16xf32> to vector<16x16xbf16>
      %c0_71 = arith.constant 0 : index
      %c0_72 = arith.constant 0 : index
      %90 = vector.load %arg9[%c0_71, %c0_72] : memref<16x16xbf16, #tpu.memory_space<vmem>>, vector<16x16xbf16>
      tpu.vector_store %arg9[%c0_71, %c0_72], %89 {strides = array<i32>} : memref<16x16xbf16, #tpu.memory_space<vmem>>, vector<16x16xbf16>,
    } else {
    }
    %c0 = arith.constant 0 : index
    %c0_1 = arith.constant 0 : index
    %c0_2 = arith.constant 0 : index
    %c0_3 = arith.constant 0 : index
    %3 = vector.load %arg4[%c0, %c0_1, %c0_2, %c0_3] : memref<1x1x8x2xf32, #tpu.memory_space<vmem>>, vector<1x1x8x2xf32>
    %4 = vector.shape_cast %3 : vector<1x1x8x2xf32> to vector<8x2xf32>
    %c0_4 = arith.constant 0 : index
    %c0_5 = arith.constant 0 : index
    %c0_6 = arith.constant 0 : index
    %c0_7 = arith.constant 0 : index
    %c0_8 = arith.constant 0 : index
    %c0_9 = arith.constant 0 : index
    %5 = vector.load %arg6[%c0_4, %c0_5, %c0_6, %c0_7, %c0_8, %c0_9] : memref<1x1x2x2x8x16xbf16, #tpu.memory_space<vmem>>, vector<1x1x1x1x8x16xbf16>
    %6 = vector.shape_cast %5 : vector<1x1x1x1x8x16xbf16> to vector<8x16xbf16>
    %7 = arith.extf %6 : vector<8x16xbf16> to vector<8x16xf32>
    %8 = vector.extract_strided_slice %4 {offsets = [0, 0], sizes = [8, 1], strides = [1, 1]} : vector<8x2xf32> to vector<8x1xf32>
    %9 = vector.broadcast %8 : vector<8x1xf32> to vector<8x16xf32>
    %10 = arith.mulf %7, %9 : vector<8x16xf32>
    %c0_10 = arith.constant 0 : index
    %c0_11 = arith.constant 0 : index
    %c0_12 = arith.constant 0 : index
    %c1 = arith.constant 1 : index
    %c0_13 = arith.constant 0 : index
    %c0_14 = arith.constant 0 : index
    %11 = vector.load %arg6[%c0_10, %c0_11, %c0_12, %c1, %c0_13, %c0_14] : memref<1x1x2x2x8x16xbf16, #tpu.memory_space<vmem>>, vector<1x1x1x1x8x16xbf16>
    %12 = vector.shape_cast %11 : vector<1x1x1x1x8x16xbf16> to vector<8x16xbf16>
    %13 = arith.extf %12 : vector<8x16xbf16> to vector<8x16xf32>
    %14 = vector.extract_strided_slice %4 {offsets = [0, 0], sizes = [8, 1], strides = [1, 1]} : vector<8x2xf32> to vector<8x1xf32>
    %15 = vector.broadcast %14 : vector<8x1xf32> to vector<8x16xf32>
    %16 = arith.mulf %13, %15 : vector<8x16xf32>
    %c0_15 = arith.constant 0 : index
    %c0_16 = arith.constant 0 : index
    %c1_17 = arith.constant 1 : index
    %c0_18 = arith.constant 0 : index
    %c0_19 = arith.constant 0 : index
    %c0_20 = arith.constant 0 : index
    %17 = vector.load %arg6[%c0_15, %c0_16, %c1_17, %c0_18, %c0_19, %c0_20] : memref<1x1x2x2x8x16xbf16, #tpu.memory_space<vmem>>, vector<1x1x1x1x8x16xbf16>
    %18 = vector.shape_cast %17 : vector<1x1x1x1x8x16xbf16> to vector<8x16xbf16>
    %19 = arith.extf %18 : vector<8x16xbf16> to vector<8x16xf32>
    %20 = vector.extract_strided_slice %4 {offsets = [0, 1], sizes = [8, 1], strides = [1, 1]} : vector<8x2xf32> to vector<8x1xf32>
    %21 = vector.broadcast %20 : vector<8x1xf32> to vector<8x16xf32>
    %22 = arith.mulf %19, %21 : vector<8x16xf32>
    %23 = arith.addf %10, %22 : vector<8x16xf32>
    %c0_21 = arith.constant 0 : index
    %c0_22 = arith.constant 0 : index
    %c1_23 = arith.constant 1 : index
    %c1_24 = arith.constant 1 : index
    %c0_25 = arith.constant 0 : index
    %c0_26 = arith.constant 0 : index
    %24 = vector.load %arg6[%c0_21, %c0_22, %c1_23, %c1_24, %c0_25, %c0_26] : memref<1x1x2x2x8x16xbf16, #tpu.memory_space<vmem>>, vector<1x1x1x1x8x16xbf16>
    %25 = vector.shape_cast %24 : vector<1x1x1x1x8x16xbf16> to vector<8x16xbf16>
    %26 = arith.extf %25 : vector<8x16xbf16> to vector<8x16xf32>
    %27 = vector.extract_strided_slice %4 {offsets = [0, 1], sizes = [8, 1], strides = [1, 1]} : vector<8x2xf32> to vector<8x1xf32>
    %28 = vector.broadcast %27 : vector<8x1xf32> to vector<8x16xf32>
    %29 = arith.mulf %26, %28 : vector<8x16xf32>
    %30 = arith.addf %16, %29 : vector<8x16xf32>
    %c0_27 = arith.constant 0 : index
    %c0_28 = arith.constant 0 : index
    %31 = vector.load %arg9[%c0_27, %c0_28] : memref<16x16xbf16, #tpu.memory_space<vmem>>, vector<16x16xbf16>
    %32 = arith.truncf %23 : vector<8x16xf32> to vector<8x16xbf16>
    %cst = arith.constant dense<0.000000e+00> : vector<16x8xf32>
    %33 = tpu.matmul %31, %32, %cst {dimension_numbers = #tpu.dot_dimension_numbers<[1], [1], [0], [0], [0, 0, 1, 0], [], []>} : vector<16x16xbf16>, vector<8x16xbf16>, vector<16x8xf32> -> vector<16x8xf32>
    %cst_29 = arith.constant 2.000000e-02 : f32
    %34 = vector.broadcast %cst_29 : f32 to vector<16x8xf32>
    %35 = arith.mulf %33, %34 : vector<16x8xf32>
    %36 = math.tanh %35 : vector<16x8xf32>
    %cst_30 = arith.constant 5.000000e+01 : f32
    %37 = vector.broadcast %cst_30 : f32 to vector<16x8xf32>
    %38 = arith.mulf %36, %37 : vector<16x8xf32>
    %c0_31 = arith.constant 0 : index
    %c0_32 = arith.constant 0 : index
    %39 = vector.load %arg10[%c0_31, %c0_32] : memref<16x1xf32, #tpu.memory_space<vmem>>, vector<16x1xf32>
    %cst_33 = arith.constant dense<0xFF800000> : vector<16xf32>
    %40 = vector.multi_reduction <maximumf>, %38, %cst_33 [1] : vector<16x8xf32> to vector<16xf32>
    %41 = vector.shape_cast %40 : vector<16xf32> to vector<16x1xf32>
    %42 = arith.maximumf %39, %41 : vector<16x1xf32>
    %43 = arith.subf %39, %42 : vector<16x1xf32>
    %44 = math.exp %43 : vector<16x1xf32>
    %45 = vector.broadcast %42 : vector<16x1xf32> to vector<16x8xf32>
    %46 = arith.subf %38, %45 : vector<16x8xf32>
    %47 = math.exp %46 : vector<16x8xf32>
    %c0_34 = arith.constant 0 : index
    %c0_35 = arith.constant 0 : index
    %48 = vector.load %arg11[%c0_34, %c0_35] : memref<16x1xf32, #tpu.memory_space<vmem>>, vector<16x1xf32>
    %49 = arith.mulf %44, %48 : vector<16x1xf32>
    %cst_36 = arith.constant dense<0.000000e+00> : vector<16xf32>
    %50 = vector.multi_reduction <add>, %47, %cst_36 [1] : vector<16x8xf32> to vector<16xf32>
    %51 = vector.shape_cast %50 : vector<16xf32> to vector<16x1xf32>
    %52 = arith.addf %49, %51 : vector<16x1xf32>
    %c0_37 = arith.constant 0 : index
    %c0_38 = arith.constant 0 : index
    %53 = vector.load %arg11[%c0_37, %c0_38] : memref<16x1xf32, #tpu.memory_space<vmem>>, vector<16x1xf32>
    tpu.vector_store %arg11[%c0_37, %c0_38], %52 {strides = array<i32>} : memref<16x1xf32, #tpu.memory_space<vmem>>, vector<16x1xf32>,
    %c0_39 = arith.constant 0 : index
    %c0_40 = arith.constant 0 : index
    %54 = vector.load %arg12[%c0_39, %c0_40] : memref<16x16xf32, #tpu.memory_space<vmem>>, vector<16x16xf32>
    %55 = vector.broadcast %44 : vector<16x1xf32> to vector<16x16xf32>
    %56 = arith.mulf %55, %54 : vector<16x16xf32>
    %57 = arith.truncf %47 : vector<16x8xf32> to vector<16x8xbf16>
    %58 = arith.truncf %30 : vector<8x16xf32> to vector<8x16xbf16>
    %cst_41 = arith.constant dense<0.000000e+00> : vector<16x16xf32>
    %59 = tpu.matmul %57, %58, %cst_41 {dimension_numbers = #tpu.dot_dimension_numbers<[1], [0], [0], [1], [0, 0, 1, 1], [], []>} : vector<16x8xbf16>, vector<8x16xbf16>, vector<16x16xf32> -> vector<16x16xf32>
    %60 = arith.addf %56, %59 : vector<16x16xf32>
    %c0_42 = arith.constant 0 : index
    %c0_43 = arith.constant 0 : index
    %61 = vector.load %arg12[%c0_42, %c0_43] : memref<16x16xf32, #tpu.memory_space<vmem>>, vector<16x16xf32>
    tpu.vector_store %arg12[%c0_42, %c0_43], %60 {strides = array<i32>} : memref<16x16xf32, #tpu.memory_space<vmem>>, vector<16x16xf32>,
    %c0_44 = arith.constant 0 : index
    %c0_45 = arith.constant 0 : index
    %62 = vector.load %arg10[%c0_44, %c0_45] : memref<16x1xf32, #tpu.memory_space<vmem>>, vector<16x1xf32>
    tpu.vector_store %arg10[%c0_44, %c0_45], %42 {strides = array<i32>} : memref<16x1xf32, #tpu.memory_space<vmem>>, vector<16x1xf32>,
    %c1_i32 = arith.constant 1 : i32
    %63 = arith.cmpi eq, %arg2, %c1_i32 : i32
    %64 = arith.extui %63 : i1 to i32
    %c0_i32_46 = arith.constant 0 : i32
    %65 = arith.cmpi ne, %64, %c0_i32_46 : i32
    scf.if %65 {
      %c0_47 = arith.constant 0 : index
      %c0_48 = arith.constant 0 : index
      %c0_49 = arith.constant 0 : index
      %c0_50 = arith.constant 0 : index
      %66 = vector.load %arg3[%c0_47, %c0_48, %c0_49, %c0_50] : memref<1x1x16x2xf32, #tpu.memory_space<vmem>>, vector<1x1x16x2xf32>
      %67 = vector.shape_cast %66 : vector<1x1x16x2xf32> to vector<16x2xf32>
      %c0_51 = arith.constant 0 : index
      %c0_52 = arith.constant 0 : index
      %68 = vector.load %arg12[%c0_51, %c0_52] : memref<16x16xf32, #tpu.memory_space<vmem>>, vector<16x16xf32>
      %c0_53 = arith.constant 0 : index
      %c0_54 = arith.constant 0 : index
      %69 = vector.load %arg11[%c0_53, %c0_54] : memref<16x1xf32, #tpu.memory_space<vmem>>, vector<16x1xf32>
      %70 = tpu.reciprocal %69 {approx = true} : vector<16x1xf32> -> vector<16x1xf32>
      %71 = vector.broadcast %70 : vector<16x1xf32> to vector<16x16xf32>
      %72 = arith.mulf %68, %71 : vector<16x16xf32>
      %73 = arith.truncf %72 : vector<16x16xf32> to vector<16x16xbf16>
      %c0_55 = arith.constant 0 : index
      %c0_56 = arith.constant 0 : index
      %c0_57 = arith.constant 0 : index
      %c0_58 = arith.constant 0 : index
      %74 = vector.load %arg7[%c0_55, %c0_56, %c0_57, %c0_58] : memref<1x2x16x32xbf16, #tpu.memory_space<vmem>>, vector<1x1x16x32xbf16>
      %75 = vector.shape_cast %74 : vector<1x1x16x32xbf16> to vector<16x32xbf16>
      %cst_59 = arith.constant dense<0.000000e+00> : vector<16x32xf32>
      %76 = tpu.matmul %73, %75, %cst_59 {dimension_numbers = #tpu.dot_dimension_numbers<[1], [0], [0], [1], [0, 0, 1, 1], [], []>} : vector<16x16xbf16>, vector<16x32xbf16>, vector<16x32xf32> -> vector<16x32xf32>
      %77 = vector.extract_strided_slice %67 {offsets = [0, 0], sizes = [16, 1], strides = [1, 1]} : vector<16x2xf32> to vector<16x1xf32>
      %78 = vector.broadcast %77 : vector<16x1xf32> to vector<16x32xf32>
      %79 = arith.mulf %76, %78 : vector<16x32xf32>
      %c0_60 = arith.constant 0 : index
      %c1_61 = arith.constant 1 : index
      %c0_62 = arith.constant 0 : index
      %c0_63 = arith.constant 0 : index
      %80 = vector.load %arg7[%c0_60, %c1_61, %c0_62, %c0_63] : memref<1x2x16x32xbf16, #tpu.memory_space<vmem>>, vector<1x1x16x32xbf16>
      %81 = vector.shape_cast %80 : vector<1x1x16x32xbf16> to vector<16x32xbf16>
      %cst_64 = arith.constant dense<0.000000e+00> : vector<16x32xf32>
      %82 = tpu.matmul %73, %81, %cst_64 {dimension_numbers = #tpu.dot_dimension_numbers<[1], [0], [0], [1], [0, 0, 1, 1], [], []>} : vector<16x16xbf16>, vector<16x32xbf16>, vector<16x32xf32> -> vector<16x32xf32>
      %83 = vector.extract_strided_slice %67 {offsets = [0, 1], sizes = [16, 1], strides = [1, 1]} : vector<16x2xf32> to vector<16x1xf32>
      %84 = vector.broadcast %83 : vector<16x1xf32> to vector<16x32xf32>
      %85 = arith.mulf %82, %84 : vector<16x32xf32>
      %86 = arith.addf %79, %85 : vector<16x32xf32>
      %c0_65 = arith.constant 0 : index
      %c0_66 = arith.constant 0 : index
      %c0_67 = arith.constant 0 : index
      %c0_68 = arith.constant 0 : index
      %87 = vector.load %arg8[%c0_65, %c0_66, %c0_67, %c0_68] : memref<1x1x16x32xf32, #tpu.memory_space<vmem>>, vector<1x1x16x32xf32>
      %88 = vector.shape_cast %87 : vector<1x1x16x32xf32> to vector<16x32xf32>
      %89 = vector.shape_cast %86 : vector<16x32xf32> to vector<1x1x16x32xf32>
      tpu.vector_store %arg8[%c0_65, %c0_66, %c0_67, %c0_68], %89 {strides = array<i32>} : memref<1x1x16x32xf32, #tpu.memory_space<vmem>>, vector<1x1x16x32xf32>,
    } else {
    }
    return
  }
  func.func @transform_0(%arg0: i32, %arg1: i32, %arg2: i32) -> (i32, i32, i32, i32) {
    %c0_i32 = arith.constant 0 : i32
    %c0_i32_0 = arith.constant 0 : i32
    %c0_i32_1 = arith.constant 0 : i32
    return %arg0, %arg1, %c0_i32, %c0_i32_0 : i32, i32, i32, i32
  }
  func.func @transform_1(%arg0: i32, %arg1: i32, %arg2: i32) -> (i32, i32, i32, i32) {
    %c0_i32 = arith.constant 0 : i32
    %c0_i32_0 = arith.constant 0 : i32
    return %arg0, %arg1, %arg2, %c0_i32 : i32, i32, i32, i32
  }
  func.func @transform_2(%arg0: i32, %arg1: i32, %arg2: i32) -> (i32, i32, i32, i32, i32) {
    %c0_i32 = arith.constant 0 : i32
    %c0_i32_0 = arith.constant 0 : i32
    %c0_i32_1 = arith.constant 0 : i32
    %c0_i32_2 = arith.constant 0 : i32
    return %arg0, %arg1, %c0_i32, %c0_i32_0, %c0_i32_1 : i32, i32, i32, i32, i32
  }
  func.func @transform_3(%arg0: i32, %arg1: i32, %arg2: i32) -> (i32, i32, i32, i32, i32, i32) {
    %c0_i32 = arith.constant 0 : i32
    %c0_i32_0 = arith.constant 0 : i32
    %c0_i32_1 = arith.constant 0 : i32
    %c0_i32_2 = arith.constant 0 : i32
    return %arg0, %arg1, %c0_i32, %c0_i32_0, %arg2, %c0_i32_1 : i32, i32, i32, i32, i32, i32
  }
  func.func @transform_4(%arg0: i32, %arg1: i32, %arg2: i32) -> (i32, i32, i32, i32) {
    %c0_i32 = arith.constant 0 : i32
    %c0_i32_0 = arith.constant 0 : i32
    %c0_i32_1 = arith.constant 0 : i32
    %c0_i32_2 = arith.constant 0 : i32
    return %arg1, %c0_i32, %c0_i32_0, %c0_i32_1 : i32, i32, i32, i32
  }
  func.func @transform_5(%arg0: i32, %arg1: i32, %arg2: i32) -> (i32, i32, i32, i32) {
    %c0_i32 = arith.constant 0 : i32
    %c0_i32_0 = arith.constant 0 : i32
    %c0_i32_1 = arith.constant 0 : i32
    return %arg0, %arg1, %c0_i32, %c0_i32_0 : i32, i32, i32, i32
  }
}

</mosaic_0001>

<bundles_post_ra>
// kernel: tpu_custom_call.1
= control target key start
LH: loop header
LB: loop body
LE: loop exit
PB: predicated region body
PF: predicated region fallthrough
CT: control target
= control target key end

     0   :  { %s1849_s0 = inlined_call_operand.vmem [shape: f32[2,4,16,2], index: 0, kind: input, shape index: {}]   ;;  %s1850_s1 = inlined_call_operand.vmem [shape: f32[2,4,16,2], index: 1, kind: input, shape index: {}]   ;;  %s1851_s2 = inlined_call_operand.hbm [shape: bf16[2,4,2,16,16], index: 2, kind: input, shape index: {}]   ;;  %s1852_s3 = inlined_call_operand.vmem [shape: bf16[2,4,2,2,16,16], index: 3, kind: input, shape index: {}]   ;;  %s1853_s4 = inlined_call_operand.hbm [shape: bf16[4,2,16,32], index: 4, kind: input, shape index: {}]   ;;  %s1854_s5 = inlined_call_operand.hbm [shape: f32[2,4,16,32], index: 5, kind: output, shape index: {}]  }
   0x1   :  { %1874 = sst [smem:[#allocation32_spill]] %s1849_s0 }
   0x2   :  { %1875 = sst [smem:[#allocation33_spill]] %s1850_s1 }
   0x3   :  { %1876 = sst [smem:[#allocation34_spill]] %s1851_s2 }
   0x4   :  { %1877 = sst [smem:[#allocation35_spill]] %s1852_s3 }
   0x5   :  { %1878 = sst [smem:[#allocation36_spill]] %s1853_s4 }
   0x6   :  { %1879 = sst [smem:[#allocation37_spill]] %s1854_s5 }
   0x7   :  { %10 = vsyncpa [#allocation7], 0 }
   0x8   :  { %12 = vsyncpa [#allocation7 + $0x1], 0 }
   0x9   :  { %13 = vsyncpa [#allocation11], 0 }
   0xa   :  { %15 = vsyncpa [#allocation11 + $0x1], 0 }
   0xb   :  { %16 = vsyncpa [#allocation8], 0 }
   0xc   :  { %18 = vsyncpa [#allocation8 + $0x1], 0  ;;  %s1485_s18 = smov 0   ;;  %s1487_s19 = smov 0  }
   0xd   :  { %s1489_s20 = smov 0   ;;  %s1491_s21 = smov 0  }
   0xe   :  { %s1493_s22 = smov 0   ;;  %s1495_s23 = smov 0  }
   0xf   :  { %s1497_s24 = smov 0   ;;  %s1499_s25 = smov 0  }
  0x10   :  { %s1501_s26 = smov 0   ;;  %s1503_s27 = smov 0  }
  0x11   :  { %s1505_s28 = smov 0   ;;  %s1507_s29 = smov 0  }
  0x12   :  { %s1509_s30 = smov 0   ;;  %s1511_s6 = smov 0  }
  0x13   :  { %s1513_s7 = smov 0  }
  0x14 LB: > { %1880 = sst [smem:[#allocation16_spill]] %s1397_s21  ;;  %s1855_s8 = sadd.s32 4294967295, %s1441_s7   ;;  %s1441_s7 = sphi %s1513_s7, %s24_s7   ;;  %s1437_s6 = sphi %s1511_s6, %s1939_s6   ;;  %s1433_s30 = sphi %s1509_s30, %s1938_s30   ;;  %s1429_s29 = sphi %s1507_s29, %s1951_s29   ;;  %s1425_s28 = sphi %s1505_s28, %s1936_s28   ;;  %s1421_s27 = sphi %s1503_s27, %s1950_s27   ;;  %s1417_s26 = sphi %s1501_s26, %s1949_s26   ;;  %s1413_s25 = sphi %s1499_s25, %s1948_s25   ;;  %s1409_s24 = sphi %s1497_s24, %s1947_s24   ;;  %s1405_s23 = sphi %s1495_s23, %s1946_s23   ;;  %s1401_s22 = sphi %s1493_s22, %s1945_s22   ;;  %s1397_s21 = sphi %s1491_s21, %s1944_s21   ;;  %s1393_s20 = sphi %s1489_s20, %s1943_s20   ;;  %s1389_s19 = sphi %s1487_s19, %s1942_s19   ;;  %s1385_s18 = sphi %s1485_s18, %s1941_s18  }
  0x15   : > { %1881 = sst [smem:[#allocation17_spill]] %s1405_s23  ;;  %s36_s10 = sadd.s32 1, %s1429_s29 }
  0x16   : > { %1882 = sst [smem:[#allocation18_spill]] %s1417_s26  ;;  %s39_s11 = sadd.s32 1, %s1433_s30 }
  0x17   : > { %1883 = sst [smem:[#allocation19_spill]] %s1421_s27  ;;  %p37_p0 = scmp.ge.s32.totalorder %s36_s10, 2 }
  0x18   : > { %1884 = sst [smem:[#allocation20_spill]] %s1425_s28  ;;  %s43_s12 = sadd.s32 1, %s1437_s6 }
  0x19   : > { %1885 = sst [smem:[#allocation21_spill]] %s1433_s30  ;;  %p117_p1 = scmp.ne.s32.totalorder %s1413_s25, %s1409_s24 }
  0x1a   : > { %1886 = sst [smem:[#allocation22_spill]] %s1437_s6  ;;  %s1953_s10 = smov (%p37_p0, %s36_s10), 0 }
  0x1b   : > { %1887 = sst [smem:[#allocation23_spill]] %s1953_s10  ;;  %s1955_s11 = smov (!%p37_p0, %s39_s11), %s1433_s30 }
  0x1c   : > { %p118_p2 = scmp.eq.s32.totalorder %s1441_s7, 0  ;;  %p1863_p3 = scmp.ne.s32.totalorder %s1409_s24, %s1405_s23 }
  0x1d   : > { %p41_p4 = scmp.ge.s32.totalorder %s1955_s11, 4  ;;  %p1576_p5 = scmp.eq.s32.totalorder %s1855_s8, 0 }
  0x1e   : > { %p1585_p6 = por %p118_p2, %p117_p1  ;;  %s136_s16 = ssub.s32 %s1429_s29, %s1953_s10 }
  0x1f   : > { %s1957_s11 = smov (%p41_p4, %s1955_s11), 0  ;;  %s1959_s12 = smov (!%p41_p4, %s43_s12), %s1437_s6 }
  0x20   : > { %1890 = sst [smem:[#allocation24_spill]] %s1957_s11  ;;  %s106_s17 = ssub.s32 %s1433_s30, %s1957_s11 }
  0x21   : > { %p1601_p7 = por %p1576_p5, %p1863_p3  ;;  %p45_p8 = scmp.ge.s32.totalorder %s1959_s12, 2 }
  0x22   : > { %s140_s8 = sadd.s32 1, %s1401_s22  ;;  %p147_p9 = scmp.ne.s32.totalorder %s1401_s22, %s1397_s21 }
  0x23   : > { %p164_p10 = scmp.eq.s32.totalorder %s106_s17, 0  ;;  %s1961_s12 = smov (%p45_p8, %s1959_s12), 0 }
  0x24   : > { %1892 = sst [smem:[#allocation25_spill]] %s1961_s12  ;;  %p1612_p11 = por %p147_p9, %p118_p2 }
  0x25   : > { %s166_s11 = sadd.s32 1, %s1393_s20  ;;  %s105_s10 = ssub.s32 %s1437_s6, %s1961_s12 }
  0x26   : > { %p173_p12 = scmp.ne.s32.totalorder %s1393_s20, %s1389_s19  ;;  %s107_s5 = sor.u32 %s106_s17, %s105_s10 }
  0x27   : > { %p179_p13 = scmp.ne.s32.totalorder %s1389_s19, %s1385_s18  ;;  %p108_p0 = scmp.eq.s32.totalorder %s107_s5, 0 }
  0x28   : > { %s137_s1 = sor.u32 %s136_s16, %s107_s5  ;;  %p1625_p8 = por %p173_p12, %p118_p2 }
  0x29   : > { %p138_p4 = scmp.eq.s32.totalorder %s137_s1, 0  ;;  %s1895_s26 = sadd.s32 1, %s1413_s25 }
  0x2a   : > { %s1632_s27 = scalar_select %p108_p0, %s1413_s25, %s1895_s26  }
  0x2b   : > { %s1635_s28 = scalar_select %p138_p4, %s1401_s22, %s140_s8  }
  0x2c   : > { %1896 = sst [smem:[#allocation26_spill]] %s1632_s27  ;;  %p1643_p9 = por %p179_p13, %p1576_p5 }
  0x2d   : > { %1897 = sst [smem:[#allocation27_spill]] %s1635_s28  ;;  %s1901_s5 = sadd.s32 4294967295, %s1441_s7  }
  0x2e   : > { %s1639_s21 = scalar_select %p164_p10, %s1393_s20, %s166_s11  }
  0x2f   : > { %s1899_s10 = scalar_select %p1643_p9, 1, 0 }
  0x30   : > { %1898 = sst [smem:[#allocation28_spill]] %s1639_s21  ;;  %p205_p3 = scmp.eq.s32.totalorder %s1901_s5, 15 }
  0x31   : > { %1900 = sst [smem:[#allocation29_spill]] %s1899_s10  ;;  %s1902_s1 = sadd.s32 4294967294, %s1441_s7  }
  0x32   : > { %p211_p2 = scmp.eq.s32.totalorder %s1902_s1, 15  ;;  %p1654_p12 = por %p205_p3, %p117_p1 }
  0x33   : > { %p1905_p0 = scmp.ne.s32.totalorder %s1409_s24, %s1405_s23  ;;  %p989_p10 = scmp.ge.s32.totalorder %s1441_s7, 16 }
  0x34   : > { %s1903_s18 = scalar_select %p1654_p12, 1, 0 }
  0x35   : > { %p1661_p4 = por %p211_p2, %p1905_p0  ;;  %227 = sbr.rel (%p989_p10) target bundleno = 87 (0x57), region = 16 }
  0x36   : > { %1904 = sst [smem:[#allocation30_spill]] %s1903_s18  ;;  %s258_s8 = sand.u32 (!%p989_p10), 1, %s1413_s25  }
  0x37   : > { %s1906_s26 = scalar_select %p1661_p4, 1, 0 }
  0x38   : > { %s991_s11 = sshll.u32 (!%p989_p10), %s1433_s30, 2  ;;  %s990_s14 = sshll.u32 (!%p989_p10), %s258_s8, 4 }
  0x39   : > { %1907 = sst [smem:[#allocation31_spill]] %s1906_s26  ;;  %s992_s16 = sshll.u32 (!%p989_p10), %s1437_s6, 4 }
  0x3a   : > { %s267_s17 = sadd.s32 %s992_s16, %s991_s11  ;;  %s262_s5 = scalar_lea.vmem [#allocation6], %s990_s14 }
  0x3b   : > { %s272_s1 = sshll.u32 %s262_s5, 4  ;;  %s993_s12 = sshll.u32 %s267_s17, 2  ;;  %s273_s1 = int_to_ptr.vmem [resolvable:$true] %s272_s1 }
  0x3c   : > { %s1908_s2 = sld [smem:[#allocation34_spill]]  ;;  %s259_s23 = scalar_lea.sflag [#allocation7], %s258_s8 }
  0x3d   : > { %s1443_s18 = smov 64   ;;  %s1444_s10 = smov 4  }
  0x3e   : > { %s283_s11 = sand.u32 (%p1612_p11), 1, %s1401_s22   ;;  %s995_s27 = sshll.u32 (%p1612_p11), %s1433_s30, 3 }
  0x3f   : > { %s994_s28 = sshll.u32 (%p1612_p11), %s283_s11, 4  ;;  %s1909_s3 = sld [smem:[#allocation35_spill]] (%p1612_p11) }
  0x40   : > { %281 = sbr.rel (!%p1612_p11) target bundleno = 77 (0x4d), region = 32 }
  0x42   : > { %s269_s21 = scalar_lea.hbm %s1908_s2, %s993_s12  ;;  %s996_s12 = sshll.u32 (%p1612_p11), %s1437_s6, 5 }
  0x43   : > { %s270_s26 = sshll.u32 %s269_s21, 4  ;;  %s287_s21 = sadd.s32 (%p1612_p11), %s1429_s29, %s995_s27  ;;  %s271_s26 = int_to_ptr.hbm [resolvable:$true] %s270_s26 }
  0x44   : > { %1056 = dma.hbm_to_vmem [thread:$0]  (%p1585_p6), %s271_s26, 256, %s273_s1, %s259_s23, %s1443_s18, %s1443_s18, %s1444_s10  }
  0x45   : > { %s289_s8 = sadd.s32 %s996_s12, %s287_s21  ;;  %s285_s23 = scalar_lea.vmem [#allocation9], %s994_s28 }
  0x46   : > { %s997_s14 = sshll.u32 %s289_s8, 2 }
  0x47   : > { %s291_s17 = scalar_lea.vmem %s1909_s3, %s997_s14 }
  0x48   : > { %v308_v0 = vld [vmem:[%s291_s17] sm:$0xf]  ;;  %v310_v1 = vld [vmem:[%s291_s17 + $0x8] sm:$0xf]  ;;  %v312_v2 = vld [vmem:[%s291_s17 + $0x10] sm:$0xf] }
  0x49   : > { %309 = vst [vmem:[%s285_s23] sm:$0xf] %v308_v0  ;;  %v314_v3 = vld [vmem:[%s291_s17 + $0x18] sm:$0xf] }
  0x4a   : > { %311 = vst [vmem:[%s285_s23 + $0x4] sm:$0xf] %v310_v1 }
  0x4b   : > { %313 = vst [vmem:[%s285_s23 + $0x8] sm:$0xf] %v312_v2 }
  0x4c   : > { %315 = vst [vmem:[%s285_s23 + $0xc] sm:$0xf] %v314_v3 }
  0x4d PF: > { %s348_s13 = sand.u32 1, %s1393_s20   ;;  %s1043_s26 = sshll.u32 %s1433_s30, 4 }
  0x4e   : > { %s998_s5 = sshll.u32 %s348_s13, 4  ;;  %s1910_s4 = sld [smem:[#allocation36_spill]] }
  0x4f   : > { %s352_s12 = scalar_lea.vmem [#allocation10], %s998_s5  ;;  %s349_s28 = scalar_lea.sflag [#allocation11], %s348_s13 }
  0x50   : > { %s360_s8 = sshll.u32 %s352_s12, 4  ;;  %s361_s8 = int_to_ptr.vmem [resolvable:$true] %s360_s8 }
  0x54   : > { %s357_s27 = scalar_lea.hbm %s1910_s4, %s1043_s26 }
  0x55   : > { %s358_s21 = sshll.u32 %s357_s27, 4  ;;  %s359_s21 = int_to_ptr.hbm [resolvable:$true] %s358_s21 }
  0x56   : > { %1057 = dma.hbm_to_vmem [thread:$0]  (%p1625_p8), %s359_s21, 256, %s361_s8, %s349_s28, %s1443_s18, %s1443_s18, %s1444_s10  }
  0x57 PF: > { %p1001_p1 = scmp.ge.s32.totalorder %s1441_s7, 1  ;;  %p368_p3 = scmp.lt.s32.totalorder %s1441_s7, 17 }
  0x59   : > { %p369_p5 = pnand %p1001_p1, %p368_p3 }
  0x5a   : > { %s1699_s14 = sand.u32 (!%p369_p5), 1, %s1409_s24  }
  0x5b   : > { %372 = sbr.rel (%p369_p5) target bundleno = 1204 (0x4b4), region = 77  ;;  %s1871_s16 = sshll.u32 (!%p369_p5), %s1699_s14, 4 }
  0x5c   : > { %s375_s0 = scalar_lea.sflag (!%p369_p5), [#allocation7], %s1699_s14  ;;  %s1705_s15 = scalar_lea.vmem (!%p369_p5), [#allocation6], %s1871_s16 }
  0x60   : > { %1372 = dma.done.wait (%p1601_p7), %s375_s0, 256  }
  0x61   : > { %1374 = vsyncadd (%p1601_p7), %s375_s0, 4294967040  ;;  %s1911_s10 = sld [smem:[#allocation16_spill]]  ;;  %s391_s23 = sand.u32 1, %s1389_s19  }
  0x62   : > { %s1715_s26 = sshll.u32 %s391_s23, 4  ;;  %s392_s1 = scalar_lea.sflag [#allocation11], %s391_s23 }
  0x67   : > { %s385_s17 = sand.u32 1, %s1911_s10  }
  0x68   : > { %s1713_s13 = sshll.u32 %s385_s17, 4 }
  0x69   : > { %1376 = dma.done.wait (%p1643_p9), %s392_s1, 256  }
  0x6a   : > { %1378 = vsyncadd (%p1643_p9), %s392_s1, 4294967040  ;;  %s1913_s9 = sld [smem:[#allocation20_spill]]  ;;  %s1918_s30 = sshll.u32 %s1699_s14, 4 }
  0x6b   : > { %s1914_s27 = sld [smem:[#allocation19_spill]] }
  0x6c   : > { %s1915_s21 = sld [smem:[#allocation18_spill]] }
  0x6d   : > { %s1916_s18 = sld [smem:[#allocation32_spill]] }
  0x6e   : > { %s1917_s4 = sld [smem:[#allocation33_spill]] }
  0x70   : > { %p453_p6 = scmp.lt.s32.totalorder %s1913_s9, 1 }
  0x71   : > { %p455_p7 = scmp.lt.s32.totalorder %s1914_s27, 3 }
  0x72   : > { %s1963_s9 = smov (!%p453_p6, %s1913_s9), 1  ;;  %p466_p11 = scmp.lt.s32.totalorder %s1915_s21, 1 }
  0x73   : > { %s1965_s27 = smov (!%p455_p7, %s1914_s27), 3  ;;  %s1007_s12 = sshll.u32 %s1963_s9, 3 }
  0x74   : > { %s1006_s8 = sshll.u32 %s1965_s27, 1  ;;  %s1741_s9 = scalar_lea.vmem [#allocation12], %s1918_s30 }
  0x75   : > { %s459_s28 = sadd.s32 %s1007_s12, %s1006_s8  ;;  %p1012_p13 = scmp.ne.s32.totalorder %s1915_s21, 0 }
  0x76   : > { %s1008_s0 = sshll.u32 %s459_s28, 3 }
  0x77   : > { %s1731_s23 = scalar_lea.vmem %s1916_s18, %s1008_s0 }
  0x78   : > { %s467_s1 = scalar_select %p466_p11, %s1915_s21, 1 }
  0x79   : > { %478 = sbr.rel (%p1012_p13) target bundleno = 260 (0x104), region = 93 }
  0x7a   : > { %s469_s11 = sadd.s32 %s1006_s8, %s467_s1 }
  0x7b   : > { %s471_s5 = sadd.s32 %s1007_s12, %s469_s11 }
  0x7c   : > { %s1011_s16 = sshll.u32 %s471_s5, 3 }
  0x7d   : > { %s1737_s6 = scalar_lea.vmem %s1917_s4, %s1011_s16 }
  0x7e   : > { %v487_v4 = vld [vmem:[%s1731_s23] sm:$0xff]  ;;  %v1445_v5 = vmov 1   ;;  %v1446_v6 = vmov 0   ;;  %v488_v7 = vld [vmem:[%s1731_s23 + $0x8] sm:$0xff]  ;;  %vm479_vm0 = vcmask 7168   ;;  %v1447_v8 = vmov -inf  }
  0x7f   : > { %1200 = vset.pattern.permute.xlu1 %v1445_v5  ;;  %1199 = vset.pattern.permute.xlu0 %v1446_v6  ;;  %480 = vst.msk [vmem:[#allocation3] sm:$0xff] %vm479_vm0, %v1447_v8  ;;  %vm484_vm1 = vcmask 130048   ;;  %v1448_v9 = vmov 0.0   ;;  %v1055_v10 = vld [vmem:[%s1705_s15 + $0x8] sm:$0xff]   ;;  %v1048_v11 = vld [vmem:[%s1705_s15] sm:$0xff]   ;;  %vm526_vm2 = vcmask 125952  }
  0x80   : > { %511 = vperm.xlu1 %1200, %v487_v4   ;;  %495 = vperm.xlu0 %1199, %v487_v4   ;;  %481 = vst.msk [vmem:[#allocation3 + $0x8] sm:$0xff] %vm479_vm0, %v1447_v8  ;;  %v1053_v12 = vunpack.c.l.bf16 %v1055_v10  ;;  %v1049_v13 = vunpack.c.l.bf16 %v1048_v11  ;;  %v1054_v20 = vunpack.c.h.bf16 %v1055_v10  ;;  %v1050_v21 = vunpack.c.h.bf16 %v1048_v11 }
  0x81   : > { %482 = vst.msk [vmem:[#allocation4] sm:$0xff] %vm479_vm0, %v1448_v9 }
  0x82   : > { %483 = vst.msk [vmem:[#allocation4 + $0x8] sm:$0xff] %vm479_vm0, %v1448_v9 }
  0x83   : > { %485 = vst.msk [vmem:[#allocation5] sm:$0xff] %vm484_vm1, %v1448_v9 }
  0x84   : > { %486 = vst.msk [vmem:[#allocation5 + $0x8] sm:$0xff] %vm484_vm1, %v1448_v9 }
  0x88   : > { %515 = vperm.xlu1 %1200, %v488_v7   ;;  %500 = vperm.xlu0 %1199, %v488_v7  }
  0x90   : > { %1201 = vset.pattern.permute.xlu0 %v1445_v5 }
  0xf2   : > { %v512_v14 = vpop.permute.xlu1 %511  ;;  %v496_v15 = vpop.permute.xlu0 %495 }
  0xf3   : > { %v518_v16 = vmul.f32 %v1053_v12, %v512_v14  ;;  %v503_v17 = vmul.f32 %v1049_v13, %v496_v15 }
  0xf5   : > { %v520_v18 = vadd.f32 %v518_v16, %v503_v17 }
  0xf7   : > { %v522_v19 = vmul.f32 0.25, %v520_v18 }
  0xf9   : > { %v524_v22 = vpack.c.bf16 %v522_v19, %v522_v19 }
  0xfa   : > { %v516_v23 = vpop.permute.xlu1 %515  ;;  %v501_v24 = vpop.permute.xlu0 %500 }
  0xfb   : > { %527 = vst.msk [vmem:[#allocation2] sm:$0xf] %vm526_vm2, %v524_v22  ;;  %v519_v25 = vmul.f32 %v1054_v20, %v516_v23  ;;  %v504_v26 = vmul.f32 %v1050_v21, %v501_v24 }
  0xfd   : > { %v521_v27 = vadd.f32 %v519_v25, %v504_v26 }
  0xff   : > { %v523_v28 = vmul.f32 0.25, %v521_v27 }
 0x101   : > { %v525_v29 = vpack.c.bf16 %v523_v28, %v523_v28 }
 0x103   : > { %528 = vst.msk [vmem:[#allocation2 + $0x4] sm:$0xf] %vm526_vm2, %v525_v29 }
 0x104 PF: > { %v529_v30 = vld [vmem:[%s1737_s6] sm:$0xff]  ;;  %v1449_v31 = vmov 0   ;;  %v1450_v32 = vmov 1   ;;  %s1919_s2 = scalar_lea.vmem [#allocation9], %s1713_s13  ;;  %vm564_vm3 = vcmask 130048   ;;  %vm658_vm4 = vcmask 1043456  }
 0x105   : > { %1202 = vset.pattern.permute.xlu0 %v1449_v31  ;;  %1204 = vset.pattern.permute.xlu2 %v1449_v31  ;;  %v530_v34 = vld [vmem:[%s1919_s2] sm:$0xff]   ;;  %s1920_s3 = smov %s1919_s2  ;;  %vm593_vm5 = vcmask 64512   ;;  %vm636_vm6 = vcmask 7168   ;;  %v592_v3 = vld [vmem:[#allocation3 + $0x8] sm:$0xff]  ;;  %v625_v26 = vld [vmem:[#allocation4 + $0x8] sm:$0xff]  ;;  %s1921_s4 = sld [smem:[#allocation18_spill]] }
 0x106   : > { %534 = vperm.xlu0 %1202, %v529_v30   ;;  %1205 = vset.pattern.permute.xlu1 %v1449_v31  ;;  %v1016_v35 = vld [vmem:[%s1920_s3 + $0x8] sm:$0xff]   ;;  %v531_v36 = vunpack.c.l.bf16 %v530_v34  ;;  %v540_v37 = vunpack.c.h.bf16 %v530_v34  ;;  %v624_v21 = vld [vmem:[#allocation4] sm:$0xff] }
 0x107   : > { %v544_v38 = vunpack.c.l.bf16 %v1016_v35  ;;  %v553_v39 = vunpack.c.h.bf16 %v1016_v35  ;;  %v591_v62 = vld [vmem:[#allocation3] sm:$0xff]  ;;  %v640_v35 = vld [vmem:[#allocation5 + $0x8] sm:$0xff] }
 0x10a   : > { %v1044_v51 = vld [vmem:[#allocation2] sm:$0xff] }
 0x10b   : > { %p1024_p8 = scmp.ne.s32.totalorder %s1921_s4, 1 }
 0x10c   : > { %s1922_s30 = scalar_lea.vmem (!%p1024_p8), [#allocation10], %s1715_s26 }
 0x10d   : > { %s1923_s6 = smov (!%p1024_p8), %s1922_s30 }
 0x10e   : > { %1203 = vset.pattern.permute.xlu0 %v1450_v32 }
 0x10f   : > { %546 = vperm.xlu0 %1203, %v529_v30   ;;  %v639_v30 = vld [vmem:[#allocation5] sm:$0xff] }
 0x117   : > { %1206 = vset.pattern.permute.xlu0 %v1449_v31 }
 0x178   : > { %v535_v33 = vpop.permute.xlu0 %534 }
 0x179   : > { %v537_v41 = vmul.f32 %v535_v33, %v531_v36  ;;  %v541_v42 = vmul.f32 %v540_v37, %v535_v33 }
 0x181   : > { %v547_v40 = vpop.permute.xlu0 %546 }
 0x182   : > { %v549_v43 = vmul.f32 %v547_v40, %v544_v38  ;;  %v554_v44 = vmul.f32 %v553_v39, %v547_v40 }
 0x184   : > { %v550_v45 = vadd.f32 %v549_v43, %v537_v41  ;;  %v555_v46 = vadd.f32 %v554_v44, %v541_v42 }
 0x186   : > { %v558_v47 = vpack.c.bf16 %v550_v45, %v550_v45  ;;  %v654_v48 = vpack.c.bf16 %v555_v46, %v555_v46 }
 0x188   : > { %v569_v49 = vsel %vm564_vm3, %v558_v47, 0  ;;  %v660_v50 = vsel %vm658_vm4, %v654_v48, 0 }
 0x189   : > { %578 = vmatpush.bf16.xpose.msra.mxu0 %v569_v49  ;;  %669 = vmatpush.bf16.msra.mxu1 %v660_v50 }
 0x190   : > { %1022 = vmatmul.msk.bf16.vlgmr.msra.gmra.mxu0 %vm564_vm3, %v1044_v51 }
 0x20d   : > { %v580_v52 = vpop.f32.mrf.mxu0 }
 0x20e   : > { %v585_v53 = vmul.f32 0.02, %v580_v52 }
 0x210   : > { %1207 = vtanh.f32 %v585_v53 }
 0x215   : > { %v582_v54 = vpop.f32.mrf.mxu0 }
 0x216   : > { %v1208_v55 = vpop.eup %1207  ;;  %v586_v56 = vmul.f32 0.02, %v582_v54 }
 0x217   : > { %v589_v57 = vmul.f32 50.0, %v1208_v55 }
 0x218   : > { %1209 = vtanh.f32 %v586_v56 }
 0x219   : > { %v594_v58 = vsel %vm593_vm5, %v589_v57, -inf }
 0x21a   : > { %595 = vmax.xlane.f32.xlu1 %v594_v58 }
 0x21e   : > { %v1210_v59 = vpop.eup %1209 }
 0x21f   : > { %v590_v60 = vmul.f32 50.0, %v1210_v59 }
 0x221   : > { %v597_v61 = vsel %vm593_vm5, %v590_v60, -inf }
 0x222   : > { %598 = vmax.xlane.f32.xlu1 %v597_v61 }
 0x28d   : > { %v596_v63 = vpop.xlane.xlu1 %595 }
 0x28e   : > { %v600_v0 = vmax.f32 %v591_v62, %v596_v63 }
 0x290   : > { %v602_v1 = vsub.f32 %v591_v62, %v600_v0  ;;  %680 = vst.msk [vmem:[#allocation3] sm:$0xff] %vm636_vm6, %v600_v0  ;;  %610 = vperm.xlu2 %1204, %v600_v0  }
 0x292   : > { %v604_v2 = vmul.f32 1.442695, %v602_v1 }
 0x294   : > { %1211 = vpow2.f32 %v604_v2 }
 0x295   : > { %v599_v4 = vpop.xlane.xlu1 %598 }
 0x296   : > { %v601_v5 = vmax.f32 %v592_v3, %v599_v4 }
 0x298   : > { %v603_v6 = vsub.f32 %v592_v3, %v601_v5  ;;  %681 = vst.msk [vmem:[#allocation3 + $0x8] sm:$0xff] %vm636_vm6, %v601_v5  ;;  %615 = vperm.xlu2 %1204, %v601_v5  }
 0x29a   : > { %v1212_v7 = vpop.eup %1211  ;;  %v606_v8 = vmul.f32 1.442695, %v603_v6 }
 0x29b   : > { %643 = vperm.xlu1 %1205, %v1212_v7   ;;  %v626_v22 = vmul.f32 %v1212_v7, %v624_v21 }
 0x29c   : > { %1213 = vpow2.f32 %v606_v8 }
 0x2a2   : > { %v1214_v9 = vpop.eup %1213 }
 0x2a3   : > { %648 = vperm.xlu2 %1204, %v1214_v9   ;;  %v627_v27 = vmul.f32 %v1214_v9, %v625_v26 }
 0x2ea   : > { %v611_v10 = vpop.permute.xlu2 %610 }
 0x2eb   : > { %v618_v11 = vsub.f32 %v589_v57, %v611_v10 }
 0x2ed   : > { %v620_v12 = vmul.f32 1.442695, %v618_v11 }
 0x2ef   : > { %1215 = vpow2.f32 %v620_v12 }
 0x2f2   : > { %v616_v13 = vpop.permute.xlu2 %615 }
 0x2f3   : > { %v619_v14 = vsub.f32 %v590_v60, %v616_v13 }
 0x2f5   : > { %v1216_v15 = vpop.eup %1215  ;;  %v622_v16 = vmul.f32 1.442695, %v619_v14 }
 0x2f6   : > { %v628_v17 = vsel %vm593_vm5, %v1216_v15, 0.0 }
 0x2f7   : > { %1217 = vpow2.f32 %v622_v16  ;;  %629 = vadd.xlane.f32.xlu0 %v628_v17 }
 0x2fd   : > { %v1218_v18 = vpop.eup %1217  ;;  %v649_v23 = vpop.permute.xlu2 %648 }
 0x2fe   : > { %v631_v19 = vsel %vm593_vm5, %v1218_v18, 0.0  ;;  %v653_v20 = vpack.c.bf16 %v1218_v18, %v1216_v15  ;;  %v652_v36 = vmul.f32 %v649_v23, %v640_v35 }
 0x2ff   : > { %632 = vadd.xlane.f32.xlu2 %v631_v19 }
 0x300   : > { %1023 = vmatmul.msk.bf16.vlgmr.msra.gmra.mxu1 %vm593_vm5, %v653_v20 }
 0x30d   : > { %v644_v31 = vpop.permute.xlu1 %643 }
 0x30e   : > { %v651_v32 = vmul.f32 %v644_v31, %v639_v30 }
 0x36a   : > { %v630_v24 = vpop.xlane.xlu0 %629 }
 0x36b   : > { %v634_v25 = vadd.f32 %v630_v24, %v626_v22 }
 0x36d   : > { %637 = vst.msk [vmem:[#allocation4] sm:$0xff] %vm636_vm6, %v634_v25 }
 0x372   : > { %v633_v28 = vpop.xlane.xlu2 %632 }
 0x373   : > { %v635_v29 = vadd.f32 %v633_v28, %v627_v27 }
 0x375   : > { %638 = vst.msk [vmem:[#allocation4 + $0x8] sm:$0xff] %vm636_vm6, %v635_v29 }
 0x37d   : > { %v671_v33 = vpop.f32.mrf.mxu1 }
 0x37e   : > { %v676_v34 = vadd.f32 %v671_v33, %v651_v32 }
 0x380   : > { %678 = vst.msk [vmem:[#allocation5] sm:$0xff] %vm564_vm3, %v676_v34 }
 0x384   : > { %685 = sbr.rel (%p1024_p8) target bundleno = 1179 (0x49b), region = 97 }
 0x385   : > { %v673_v37 = vpop.f32.mrf.mxu1 }
 0x386   : > { %v677_v38 = vadd.f32 %v673_v37, %v652_v36 }
 0x388   : > { %679 = vst.msk [vmem:[#allocation5 + $0x8] sm:$0xff] %vm564_vm3, %v677_v38 }
 0x389   : > { %v690_v39 = vld [vmem:[#allocation4] sm:$0xff]  ;;  %v1451_v40 = vmov 0   ;;  %v691_v41 = vld [vmem:[#allocation4 + $0x8] sm:$0xff]  ;;  %v1046_v45 = vld [vmem:[%s1923_s6 + $0x8] sm:$0xff]  ;;  %v1452_v47 = vmov 1   ;;  %vm779_vm7 = vcmask 261120  }
 0x38a   : > { %1219 = vset.pattern.permute.xlu0 %v1451_v40  ;;  %1223 = vrcp.f32 %v690_v39  ;;  %1220 = vset.pattern.permute.xlu1 %v1451_v40  ;;  %v1045_v44 = vld [vmem:[%s1922_s30] sm:$0xff]  ;;  %v686_v46 = vld [vmem:[%s1731_s23] sm:$0xff] }
 0x38b   : > { %1225 = vrcp.f32 %v691_v41  ;;  %725 = vmatpush.bf16.msra.mxu0 %v1045_v44  ;;  %760 = vmatpush.bf16.msra.mxu1 %v1046_v45  ;;  %v687_v48 = vld [vmem:[%s1731_s23 + $0x8] sm:$0xff] }
 0x38c   : > { %734 = vperm.xlu1 %1220, %v686_v46   ;;  %1221 = vset.pattern.permute.xlu2 %v1452_v47  ;;  %v688_v50 = vld [vmem:[#allocation5] sm:$0xff] }
 0x38d   : > { %768 = vperm.xlu2 %1221, %v686_v46  }
 0x38f   : > { %v689_v51 = vld [vmem:[#allocation5 + $0x8] sm:$0xff] }
 0x390   : > { %v1224_v42 = vpop.eup %1223 }
 0x391   : > { %696 = vperm.xlu0 %1219, %v1224_v42   ;;  %v1226_v43 = vpop.eup %1225 }
 0x394   : > { %739 = vperm.xlu1 %1220, %v687_v48  }
 0x395   : > { %772 = vperm.xlu2 %1221, %v687_v48  }
 0x399   : > { %701 = vperm.xlu0 %1219, %v1226_v43  }
 0x3a1   : > { %1222 = vset.pattern.permute.xlu0 %v1452_v47 }
 0x3e7   : > { %v769_v56 = vpop.permute.xlu2 %768 }
 0x3ef   : > { %v773_v63 = vpop.permute.xlu2 %772 }
 0x3fe   : > { %v735_v57 = vpop.permute.xlu1 %734 }
 0x403   : > { %v697_v49 = vpop.permute.xlu0 %696 }
 0x404   : > { %v704_v53 = vmul.f32 %v697_v49, %v688_v50 }
 0x406   : > { %v740_v0 = vpop.permute.xlu1 %739 }
 0x40b   : > { %v702_v52 = vpop.permute.xlu0 %701 }
 0x40c   : > { %v705_v54 = vmul.f32 %v702_v52, %v689_v51 }
 0x40e   : > { %v706_v55 = vpack.c.bf16 %v705_v54, %v704_v53 }
 0x410   : > { %1029 = vmatmul.msk.bf16.vlgmr.msra.gmra.mxu0 %vm564_vm3, %v706_v55  ;;  %1036 = vmatmul.msk.bf16.vlgmr.msra.gmra.mxu1 %vm564_vm3, %v706_v55 }
 0x48d   : > { %v727_v58 = vpop.f32.mrf.mxu0  ;;  %v762_v59 = vpop.f32.mrf.mxu1 }
 0x48e   : > { %v742_v60 = vmul.f32 %v735_v57, %v727_v58  ;;  %v775_v61 = vmul.f32 %v769_v56, %v762_v59 }
 0x490   : > { %v777_v62 = vadd.f32 %v775_v61, %v742_v60 }
 0x492   : > { %780 = vst.msk [vmem:[%s1741_s9] sm:$0xff] %vm779_vm7, %v777_v62 }
 0x495   : > { %v729_v1 = vpop.f32.mrf.mxu0  ;;  %v764_v2 = vpop.f32.mrf.mxu1 }
 0x496   : > { %v743_v3 = vmul.f32 %v740_v0, %v729_v1  ;;  %v776_v4 = vmul.f32 %v773_v63, %v764_v2 }
 0x498   : > { %v778_v5 = vadd.f32 %v776_v4, %v743_v3 }
 0x49a   : > { %781 = vst.msk [vmem:[%s1741_s9 + $0x8] sm:$0xff] %vm779_vm7, %v778_v5 }
 0x49b PF: > { %s1924_s16 = sld [smem:[#allocation19_spill]]  ;;  %s797_s11 = sshll.u32 %s1741_s9, 4  ;;  %s798_s11 = int_to_ptr.vmem [resolvable:$true] %s797_s11 }
 0x49c   : > { %s1925_s15 = sld [smem:[#allocation20_spill]]  ;;  %s783_s18 = scalar_lea.sflag [#allocation8], %s1699_s14 }
 0x49d   : > { %s1927_s28 = sld [smem:[#allocation37_spill]] }
 0x4a1   : > { %s1038_s26 = sshll.u32 %s1924_s16, 1 }
 0x4a2   : > { %s1039_s5 = sshll.u32 %s1925_s15, 3 }
 0x4a3   : > { %s794_s27 = sadd.s32 %s1039_s5, %s1038_s26  ;;  %s1928_s0 = smov %s1927_s28 }
 0x4a4   : > { %s1040_s21 = sshll.u32 %s794_s27, 3  ;;  %s1303_s9 = scalar_lea.hbm %s1928_s0, 128 }
 0x4a5   : > { %s796_s10 = scalar_lea.hbm %s1927_s28, %s1040_s21 }
 0x4a6   : > { %s799_s17 = sshll.u32 %s796_s10, 4  ;;  %s800_s17 = int_to_ptr.hbm [resolvable:$true] %s799_s17 }
 0x4a7   : > { %s1297_s23 = sshra.s32 %s800_s17, 4  ;;  %s1298_s23 = int_to_ptr.hbm [resolvable:$true] %s1297_s23 }
 0x4a8   : > { %s1299_s1 = scalar_lea.hbm %s1298_s23, 16  ;;  %p1304_p10 = scmp.lt.s32.totalorder %s1298_s23, %s1928_s0 }
 0x4a9   : > { %p1300_p9 = scmp.ne.s32.totalorder %s1298_s23, %s1299_s1  ;;  %p1305_p1 = scmp.lt.s32.totalorder %s1303_s9, %s1299_s1 }
 0x4ab   : > { %p1301_p2 = pnand %p1300_p9, %p1654_p12  ;;  %p1306_p3 = por %p1305_p1, %p1304_p10 }
 0x4ad   : > { %p1302_p0 = pneg %p1301_p2 }
 0x4af   : > { %p1307_p5 = pnand %p1306_p3, %p1302_p0 }
 0x4b1   : > { %1310 = shalt.err (!%p1307_p5)
}
 0x4b2   : > { %s1453_s14 = smov 128   ;;  %s1454_s6 = smov 8  }
 0x4b3   : > { %1060 = dma.vmem_to_hbm [thread:$0]  (%p1654_p12), %s798_s11, 256, %s800_s17, %s783_s18, %s1453_s14, %s1453_s14, %s1454_s6  }
 0x4b4 PF: > { %s1929_s16 = sld [smem:[#allocation17_spill]]  ;;  %p1066_p6 = scmp.ge.s32.totalorder %s1441_s7, 2 }
 0x4b6   : > { %p1063_p7 = pnand %p1066_p6, %p1661_p4 }
 0x4b8   : > { %p1064_p11 = pneg %p1063_p7 }
 0x4ba   : > { %s814_s26 = sand.u32 1, %s1929_s16  }
 0x4bb   : > { %s815_s5 = scalar_lea.sflag [#allocation8], %s814_s26 }
 0x4bc   : > { %1380 = dma.done.wait (%p1064_p11), %s815_s5, 256  }
 0x4bd   : > { %1382 = vsyncadd (%p1064_p11), %s815_s5, 4294967040  ;;  %s24_s7 = sadd.s32 1, %s1441_s7   ;;  %s1932_s13 = sld [smem:[#allocation28_spill]] }
 0x4be   : > { %p1799_p13 = scmp.ge.s32.totalorder %s24_s7, 18   ;;  %s1933_s11 = sld [smem:[#allocation27_spill]] }
 0x4bf   : > { %s1934_s12 = sld [smem:[#allocation26_spill]]  ;;  %s1941_s18 = smov %s1389_s19 }
 0x4c0   : > { %s1935_s8 = sld [smem:[#allocation21_spill]]  ;;  %s1942_s19 = smov %s1393_s20 }
 0x4c1   : > { %s1936_s28 = sld [smem:[#allocation22_spill]]  ;;  %s1944_s21 = smov %s1401_s22 }
 0x4c2   : > { %s1937_s10 = sld [smem:[#allocation23_spill]]  ;;  %s1946_s23 = smov %s1409_s24 }
 0x4c3   : > { %s1938_s30 = sld [smem:[#allocation24_spill]]  ;;  %s1943_s20 = smov %s1932_s13 }
 0x4c4   : > { %s1939_s6 = sld [smem:[#allocation25_spill]]  ;;  %s1945_s22 = smov %s1933_s11 }
 0x4c5   : > { %s1947_s24 = smov %s1413_s25  ;;  %s1948_s25 = smov %s1934_s12 }
 0x4c6   : > { %s1949_s26 = smov %s1429_s29  ;;  %s1950_s27 = smov %s1935_s8 }
 0x4c7   :  { %23 = sbr.rel (!%p1799_p13) target bundleno = 20 (0x14), region = 166 }
 0x4c8   : > { %s1951_s29 = smov %s1937_s10 }
 0x4cc   :  { %821 = vsyncpa [#allocation7], 1 }
 0x4cd   :  { %823 = vsyncpa [#allocation7 + $0x1], 1 }
 0x4ce   :  { %824 = vsyncpa [#allocation11], 1 }
 0x4cf   :  { %826 = vsyncpa [#allocation11 + $0x1], 1 }
 0x4d0   :  { %827 = vsyncpa [#allocation8], 1 }
 0x4d1   :  { %829 = vsyncpa [#allocation8 + $0x1], 1 }

</bundles_post_ra>
